<compile_context>
chip_gen: v6e
topology: v6e:2x2x1
jax: 0.10.0
libtpu: 0.0.40
codegen_flags: <defaults>
</compile_context>

<pallas_src>
import jax
import jax.numpy as jnp
from jax.experimental import pallas as pl
from jax.experimental.pallas import tpu as pltpu

BN_EPS = 1e-5
_MIB = 1024 * 1024


def _pick_tile(dim, candidates, min_blocks=1):
    """Largest candidate dividing dim with at least `min_blocks` blocks, else the full dim."""
    for c in candidates:
        if dim % c == 0 and dim // c >= min_blocks:
            return c
    return dim


def _vmem_budget(*buffer_bytes):
    """Scoped-VMEM limit from the actual tile budget: 2x headroom + 4 MiB compiler scratch,
    clamped to [32 MiB, 64 MiB] (generous on v5e/v6e's 128 MiB, never exceeds v7x's 64 MiB/TC)."""
    total = sum(int(b) for b in buffer_bytes)
    return int(min(64 * _MIB, max(32 * _MIB, 2 * total + 4 * _MIB)))


# ----------------------------------------------------------------------------- kernels


def _layer1_kernel(x_ref, w1_ref, gamma_ref, beta_ref, h_ref):
    """Linear (b1 cancelled by train-mode BN) -> BatchNorm1d(train) -> ReLU, one hidden tile.

    x arrives already in the matmul dtype (cast hoisted to the wrapper because this block is
    resident across the hidden-tile grid).  BN statistics are per-feature over the batch, so
    each hidden tile is completely independent and the math matches PyTorch exactly.
    """
    h = jnp.dot(x_ref[...], w1_ref[...], preferred_element_type=jnp.float32)  # (B, TH) f32 acc

    mean = jnp.mean(h, axis=0, keepdims=True)                                  # (1, TH)
    hm = h - mean
    var = jnp.mean(hm * hm, axis=0, keepdims=True)                             # biased, two-pass
    scale = gamma_ref[...].astype(jnp.float32) * jax.lax.rsqrt(var + BN_EPS)   # EUP rsqrt
    h = hm * scale + beta_ref[...].astype(jnp.float32)                         # folded BN affine
    h_ref[...] = jnp.maximum(h, 0.0).astype(h_ref.dtype)                       # ReLU


def _layer2_kernel(h_ref, w2_ref, b2_ref, o_ref):
    """Linear(hidden -> out) on one (B-tile, N-tile) block; K = hidden kept whole (small)."""
    acc = jnp.dot(h_ref[...], w2_ref[...], preferred_element_type=jnp.float32)
    o_ref[...] = (acc + b2_ref[...].astype(jnp.float32)).astype(o_ref.dtype)


# ----------------------------------------------------------------------------- wrappers


def _layer1_call(x, w1, gamma, beta, h_dtype, th, single_buffer_x):
    B, D = x.shape
    H = w1.shape[1]
    h_itemsize = jnp.dtype(h_dtype).itemsize

    budget = _vmem_budget(
        B * D * x.dtype.itemsize * (1 if single_buffer_x else 2),  # resident x block
        2 * D * th * w1.dtype.itemsize,                            # w1 tile, double-buffered
        2 * 2 * th * 4,                                            # gamma + beta tiles
        2 * B * th * h_itemsize,                                   # output tile
    )
    x_spec_kwargs = dict(pipeline_mode=pl.Buffered(1)) if single_buffer_x else {}

    return pl.pallas_call(
        _layer1_kernel,
        out_shape=jax.ShapeDtypeStruct((B, H), h_dtype),
        grid=(H // th,),
        in_specs=[
            pl.BlockSpec((B, D), lambda j: (0, 0), **x_spec_kwargs),  # x resident across grid
            pl.BlockSpec((D, th), lambda j: (0, j)),                  # w1 column tile, pipelined
            pl.BlockSpec((1, th), lambda j: (0, j)),                  # gamma
            pl.BlockSpec((1, th), lambda j: (0, j)),                  # beta
        ],
        out_specs=pl.BlockSpec((B, th), lambda j: (0, j)),
        compiler_params=pltpu.CompilerParams(
            dimension_semantics=("parallel",),
            vmem_limit_bytes=budget,
        ),
        cost_estimate=pl.CostEstimate(
            flops=2 * B * D * H + 8 * B * H,
            transcendentals=H,                                        # one rsqrt per feature
            bytes_accessed=B * D * x.dtype.itemsize
            + w1.size * w1.dtype.itemsize
            + 2 * H * 4                                               # gamma + beta
            + B * H * h_itemsize,
        ),
    )(x, w1, gamma, beta)


def prediction_mlp_forward(x, params):
    """x: (B, in_dim). params from init_params (weights pre-transposed to (in, out))."""
    B, D = x.shape
    w1, w2 = params["w1"], params["w2"]
    H = w1.shape[1]
    N = w2.shape[1]
    out_dtype = x.dtype
    h_dtype = w1.dtype  # bf16 weights -> bf16 (B, H) handoff between the two kernels

    # Hoist the matmul-dtype cast out of the kernel (would otherwise re-run every grid step
    # on the resident x block) and halve x's HBM/VMEM bytes when weights are bf16.
    if x.dtype != w1.dtype:
        x = x.astype(w1.dtype)

    # ---- layer 1: Linear + BN + ReLU, grid over hidden-feature tiles (all independent) ----
    # Cap the tile so real shapes (H = 512) give >= 2 grid steps (v7x megacore + DMA overlap);
    # prefer 256-aligned tiles for clean 2x256^2 MXU cadence on v6e/v7x.  Toy shapes fall back
    # to a single full-dim block (correct, just not representative of real-shape perf).
    th = _pick_tile(H, (256, 128), min_blocks=2)

    try:
        h = _layer1_call(x, w1, params["gamma"], params["beta"], h_dtype, th,
                         single_buffer_x=True)
    except Exception:
        # pipeline_mode=pl.Buffered(1) not accepted by this jax version's top-level
        # pallas_call lowering: fall back to default (double-buffered) x block.
        h = _layer1_call(x, w1, params["gamma"], params["beta"], h_dtype, th,
                         single_buffer_x=False)

    # ---- layer 2: Linear(hidden -> out), batch x out-feature parallel grid ----
    # N = in_dim (2048 for real SimSiam) -> tn = 512 keeps >= 4 N-blocks for v7x megacore
    # while amortizing per-step overhead; K = hidden stays whole (small).
    tb = _pick_tile(B, (512, 256, 128))
    tn = _pick_tile(N, (512, 256, 128))
    h_itemsize = jnp.dtype(h_dtype).itemsize
    out_itemsize = jnp.dtype(out_dtype).itemsize

    budget2 = _vmem_budget(
        2 * tb * H * h_itemsize,
        2 * H * tn * w2.dtype.itemsize,
        2 * tn * 4,
        2 * tb * tn * out_itemsize,
    )
    out = pl.pallas_call(
        _layer2_kernel,
        out_shape=jax.ShapeDtypeStruct((B, N), out_dtype),
        grid=(B // tb, N // tn),
        in_specs=[
            pl.BlockSpec((tb, H), lambda i, j: (i, 0)),
            pl.BlockSpec((H, tn), lambda i, j: (0, j)),
            pl.BlockSpec((1, tn), lambda i, j: (0, j)),
        ],
        out_specs=pl.BlockSpec((tb, tn), lambda i, j: (i, j)),
        compiler_params=pltpu.CompilerParams(
            dimension_semantics=("parallel", "parallel"),
            vmem_limit_bytes=budget2,
        ),
        cost_estimate=pl.CostEstimate(
            flops=2 * B * H * N,
            transcendentals=0,
            bytes_accessed=B * H * h_itemsize
            + w2.size * w2.dtype.itemsize
            + N * 4
            + B * N * out_itemsize,
        ),
    )(h, w2, params["b2"])
    return out


def init_params(key, in_dim, dtype=jnp.bfloat16):
    """PyTorch-default-style init. Weights stored pre-transposed as (in_features, out_features).

    Weights default to bf16 (native MXU rate on v5e/v6e/v7x; f32 accumulation is preserved
    inside the kernels).  b1 is kept for fidelity with nn.Linear / the reference, but the
    kernel omits it because TRAIN-mode BatchNorm cancels it exactly; if this forward were
    reused with eval-mode running statistics, b1 must be re-added.
    """
    hidden_dim = in_dim // 4
    out_dim = in_dim
    k1, k2, k3, k4 = jax.random.split(key, 4)

    bound1 = 1.0 / jnp.sqrt(in_dim)
    bound2 = 1.0 / jnp.sqrt(hidden_dim)

    w1 = jax.random.uniform(k1, (in_dim, hidden_dim), jnp.float32, -bound1, bound1).astype(dtype)
    b1 = jax.random.uniform(k2, (1, hidden_dim), jnp.float32, -bound1, bound1)
    w2 = jax.random.uniform(k3, (hidden_dim, out_dim), jnp.float32, -bound2, bound2).astype(dtype)
    b2 = jax.random.uniform(k4, (1, out_dim), jnp.float32, -bound2, bound2)
    gamma = jnp.ones((1, hidden_dim), jnp.float32)
    beta = jnp.zeros((1, hidden_dim), jnp.float32)
    return {"w1": w1, "b1": b1, "gamma": gamma, "beta": beta, "w2": w2, "b2": b2}


def _reference(x, p):
    """Pure-JAX f32 reference matching PyTorch train-mode forward (includes b1)."""
    h = x @ p["w1"].astype(jnp.float32) + p["b1"]
    mean = jnp.mean(h, axis=0, keepdims=True)
    var = jnp.mean((h - mean) ** 2, axis=0, keepdims=True)
    h = (h - mean) / jnp.sqrt(var + BN_EPS) * p["gamma"] + p["beta"]
    h = jnp.maximum(h, 0.0)
    return h @ p["w2"].astype(jnp.float32) + p["b2"]


if __name__ == "__main__":
    key = jax.random.PRNGKey(0)
    kx, kp = jax.random.split(key)

    # Small test shapes consistent with the module: hidden_dim = in_dim // 4 = 32.
    # TODO(synk): H < 128 leaves MXU lanes masked / stores masked; real SimSiam H=512 is lane-dense.
    B, in_dim = 8, 128
    x = jax.random.normal(kx, (B, in_dim), jnp.float32)

    # f32 path: tight check against the pure-JAX reference (validates the math exactly).
    params_f32 = init_params(kp, in_dim, dtype=jnp.float32)
    out_f32 = jax.block_until_ready(prediction_mlp_forward(x, params_f32))
    ref_f32 = _reference(x, params_f32)
    assert out_f32.shape == (B, in_dim), out_f32.shape
    assert jnp.allclose(out_f32, ref_f32, atol=1e-4, rtol=1e-4), "f32 mismatch vs JAX reference"

    # bf16 default path (native MXU rate, bf16 handoff): looser tolerance vs the f32 reference.
    params_bf16 = init_params(kp, in_dim)  # dtype defaults to bf16
    out_bf16 = jax.block_until_ready(prediction_mlp_forward(x, params_bf16))
    ref_bf16 = _reference(x, params_bf16)
    assert out_bf16.shape == (B, in_dim), out_bf16.shape
    assert jnp.allclose(out_bf16, ref_bf16, atol=8e-2, rtol=5e-2), "bf16 mismatch vs JAX reference"

    print("KERNEL_OK")
</pallas_src>

<mosaic_0001>
module attributes {stable_mosaic.version = 11 : i64} {
  func.func @_layer1_kernel(%arg0: i32, %arg1: memref<8x128xf32, #tpu.memory_space<vmem>>, %arg2: memref<128x32xf32, #tpu.memory_space<vmem>>, %arg3: memref<1x32xf32, #tpu.memory_space<vmem>>, %arg4: memref<1x32xf32, #tpu.memory_space<vmem>>, %arg5: memref<8x32xf32, #tpu.memory_space<vmem>>) attributes {dimension_semantics = [#tpu.dimension_semantics<parallel>], iteration_bounds = array<i64: 1>, scalar_prefetch = 0 : i64, scratch_operands = 0 : i64, tpu.core_type = #tpu.core_type<tc>, window_params = [{pipeline_mode = #tpu.pipeline_mode<synchronous>, transform_indices = @transform_0, window_bounds = array<i64: 8, 128>}, {transform_indices = @transform_1, window_bounds = array<i64: 128, 32>}, {transform_indices = @transform_2, window_bounds = array<i64: 1, 32>}, {transform_indices = @transform_3, window_bounds = array<i64: 1, 32>}, {transform_indices = @transform_4, window_bounds = array<i64: 8, 32>}]} {
    %c0 = arith.constant 0 : index
    %c0_0 = arith.constant 0 : index
    %0 = vector.load %arg1[%c0, %c0_0] : memref<8x128xf32, #tpu.memory_space<vmem>>, vector<8x128xf32>
    %c0_1 = arith.constant 0 : index
    %c0_2 = arith.constant 0 : index
    %1 = vector.load %arg2[%c0_1, %c0_2] : memref<128x32xf32, #tpu.memory_space<vmem>>, vector<128x32xf32>
    %cst = arith.constant dense<0.000000e+00> : vector<8x32xf32>
    %2 = tpu.matmul %0, %1, %cst {dimension_numbers = #tpu.dot_dimension_numbers<[1], [0], [0], [1], [0, 0, 1, 1], [], []>} : vector<8x128xf32>, vector<128x32xf32>, vector<8x32xf32> -> vector<8x32xf32>
    %cst_3 = arith.constant dense<0.000000e+00> : vector<32xf32>
    %3 = vector.multi_reduction <add>, %2, %cst_3 [0] : vector<8x32xf32> to vector<32xf32>
    %4 = vector.shape_cast %3 : vector<32xf32> to vector<1x32xf32>
    %cst_4 = arith.constant 8.000000e+00 : f32
    %5 = vector.broadcast %cst_4 : f32 to vector<1x32xf32>
    %6 = arith.divf %4, %5 : vector<1x32xf32>
    %7 = vector.broadcast %6 : vector<1x32xf32> to vector<8x32xf32>
    %8 = arith.subf %2, %7 : vector<8x32xf32>
    %9 = arith.mulf %8, %8 : vector<8x32xf32>
    %cst_5 = arith.constant dense<0.000000e+00> : vector<32xf32>
    %10 = vector.multi_reduction <add>, %9, %cst_5 [0] : vector<8x32xf32> to vector<32xf32>
    %11 = vector.shape_cast %10 : vector<32xf32> to vector<1x32xf32>
    %cst_6 = arith.constant 8.000000e+00 : f32
    %12 = vector.broadcast %cst_6 : f32 to vector<1x32xf32>
    %13 = arith.divf %11, %12 : vector<1x32xf32>
    %c0_7 = arith.constant 0 : index
    %c0_8 = arith.constant 0 : index
    %14 = vector.load %arg3[%c0_7, %c0_8] : memref<1x32xf32, #tpu.memory_space<vmem>>, vector<1x32xf32>
    %cst_9 = arith.constant 9.99999974E-6 : f32
    %15 = vector.broadcast %cst_9 : f32 to vector<1x32xf32>
    %16 = arith.addf %13, %15 : vector<1x32xf32>
    %17 = math.rsqrt %16 : vector<1x32xf32>
    %18 = arith.mulf %14, %17 : vector<1x32xf32>
    %19 = vector.broadcast %18 : vector<1x32xf32> to vector<8x32xf32>
    %20 = arith.mulf %8, %19 : vector<8x32xf32>
    %c0_10 = arith.constant 0 : index
    %c0_11 = arith.constant 0 : index
    %21 = vector.load %arg4[%c0_10, %c0_11] : memref<1x32xf32, #tpu.memory_space<vmem>>, vector<1x32xf32>
    %22 = vector.broadcast %21 : vector<1x32xf32> to vector<8x32xf32>
    %23 = arith.addf %20, %22 : vector<8x32xf32>
    %cst_12 = arith.constant 0.000000e+00 : f32
    %24 = vector.broadcast %cst_12 : f32 to vector<8x32xf32>
    %25 = arith.maximumf %23, %24 : vector<8x32xf32>
    %c0_13 = arith.constant 0 : index
    %c0_14 = arith.constant 0 : index
    %26 = vector.load %arg5[%c0_13, %c0_14] : memref<8x32xf32, #tpu.memory_space<vmem>>, vector<8x32xf32>
    tpu.vector_store %arg5[%c0_13, %c0_14], %25 {strides = array<i32>} : memref<8x32xf32, #tpu.memory_space<vmem>>, vector<8x32xf32>,
    return
  }
  func.func @transform_0(%arg0: i32) -> (i32, i32) {
    %c0_i32 = arith.constant 0 : i32
    %c0_i32_0 = arith.constant 0 : i32
    %c0_i32_1 = arith.constant 0 : i32
    return %c0_i32, %c0_i32_0 : i32, i32
  }
  func.func @transform_1(%arg0: i32) -> (i32, i32) {
    %c0_i32 = arith.constant 0 : i32
    %c0_i32_0 = arith.constant 0 : i32
    return %c0_i32, %arg0 : i32, i32
  }
  func.func @transform_2(%arg0: i32) -> (i32, i32) {
    %c0_i32 = arith.constant 0 : i32
    %c0_i32_0 = arith.constant 0 : i32
    return %c0_i32, %arg0 : i32, i32
  }
  func.func @transform_3(%arg0: i32) -> (i32, i32) {
    %c0_i32 = arith.constant 0 : i32
    %c0_i32_0 = arith.constant 0 : i32
    return %c0_i32, %arg0 : i32, i32
  }
  func.func @transform_4(%arg0: i32) -> (i32, i32) {
    %c0_i32 = arith.constant 0 : i32
    %c0_i32_0 = arith.constant 0 : i32
    return %c0_i32, %arg0 : i32, i32
  }
}

module attributes {stable_mosaic.version = 11 : i64} {
  func.func @_layer1_kernel(%arg0: i32, %arg1: memref<8x128xf32, #tpu.memory_space<vmem>>, %arg2: memref<128x32xf32, #tpu.memory_space<vmem>>, %arg3: memref<1x32xf32, #tpu.memory_space<vmem>>, %arg4: memref<1x32xf32, #tpu.memory_space<vmem>>, %arg5: memref<8x32xf32, #tpu.memory_space<vmem>>) attributes {dimension_semantics = [#tpu.dimension_semantics<parallel>], iteration_bounds = array<i64: 1>, scalar_prefetch = 0 : i64, scratch_operands = 0 : i64, tpu.core_type = #tpu.core_type<tc>, window_params = [{pipeline_mode = #tpu.pipeline_mode<synchronous>, transform_indices = @transform_0, window_bounds = array<i64: 8, 128>}, {transform_indices = @transform_1, window_bounds = array<i64: 128, 32>}, {transform_indices = @transform_2, window_bounds = array<i64: 1, 32>}, {transform_indices = @transform_3, window_bounds = array<i64: 1, 32>}, {transform_indices = @transform_4, window_bounds = array<i64: 8, 32>}]} {
    %c0 = arith.constant 0 : index
    %c0_0 = arith.constant 0 : index
    %0 = vector.load %arg1[%c0, %c0_0] : memref<8x128xf32, #tpu.memory_space<vmem>>, vector<8x128xf32>
    %c0_1 = arith.constant 0 : index
    %c0_2 = arith.constant 0 : index
    %1 = vector.load %arg2[%c0_1, %c0_2] : memref<128x32xf32, #tpu.memory_space<vmem>>, vector<128x32xf32>
    %cst = arith.constant dense<0.000000e+00> : vector<8x32xf32>
    %2 = tpu.matmul %0, %1, %cst {dimension_numbers = #tpu.dot_dimension_numbers<[1], [0], [0], [1], [0, 0, 1, 1], [], []>} : vector<8x128xf32>, vector<128x32xf32>, vector<8x32xf32> -> vector<8x32xf32>
    %cst_3 = arith.constant dense<0.000000e+00> : vector<32xf32>
    %3 = vector.multi_reduction <add>, %2, %cst_3 [0] : vector<8x32xf32> to vector<32xf32>
    %4 = vector.shape_cast %3 : vector<32xf32> to vector<1x32xf32>
    %cst_4 = arith.constant 8.000000e+00 : f32
    %5 = vector.broadcast %cst_4 : f32 to vector<1x32xf32>
    %6 = arith.divf %4, %5 : vector<1x32xf32>
    %7 = vector.broadcast %6 : vector<1x32xf32> to vector<8x32xf32>
    %8 = arith.subf %2, %7 : vector<8x32xf32>
    %9 = arith.mulf %8, %8 : vector<8x32xf32>
    %cst_5 = arith.constant dense<0.000000e+00> : vector<32xf32>
    %10 = vector.multi_reduction <add>, %9, %cst_5 [0] : vector<8x32xf32> to vector<32xf32>
    %11 = vector.shape_cast %10 : vector<32xf32> to vector<1x32xf32>
    %cst_6 = arith.constant 8.000000e+00 : f32
    %12 = vector.broadcast %cst_6 : f32 to vector<1x32xf32>
    %13 = arith.divf %11, %12 : vector<1x32xf32>
    %c0_7 = arith.constant 0 : index
    %c0_8 = arith.constant 0 : index
    %14 = vector.load %arg3[%c0_7, %c0_8] : memref<1x32xf32, #tpu.memory_space<vmem>>, vector<1x32xf32>
    %cst_9 = arith.constant 9.99999974E-6 : f32
    %15 = vector.broadcast %cst_9 : f32 to vector<1x32xf32>
    %16 = arith.addf %13, %15 : vector<1x32xf32>
    %17 = math.rsqrt %16 : vector<1x32xf32>
    %18 = arith.mulf %14, %17 : vector<1x32xf32>
    %19 = vector.broadcast %18 : vector<1x32xf32> to vector<8x32xf32>
    %20 = arith.mulf %8, %19 : vector<8x32xf32>
    %c0_10 = arith.constant 0 : index
    %c0_11 = arith.constant 0 : index
    %21 = vector.load %arg4[%c0_10, %c0_11] : memref<1x32xf32, #tpu.memory_space<vmem>>, vector<1x32xf32>
    %22 = vector.broadcast %21 : vector<1x32xf32> to vector<8x32xf32>
    %23 = arith.addf %20, %22 : vector<8x32xf32>
    %cst_12 = arith.constant 0.000000e+00 : f32
    %24 = vector.broadcast %cst_12 : f32 to vector<8x32xf32>
    %25 = arith.maximumf %23, %24 : vector<8x32xf32>
    %c0_13 = arith.constant 0 : index
    %c0_14 = arith.constant 0 : index
    %26 = vector.load %arg5[%c0_13, %c0_14] : memref<8x32xf32, #tpu.memory_space<vmem>>, vector<8x32xf32>
    tpu.vector_store %arg5[%c0_13, %c0_14], %25 {strides = array<i32>} : memref<8x32xf32, #tpu.memory_space<vmem>>, vector<8x32xf32>,
    return
  }
  func.func @transform_0(%arg0: i32) -> (i32, i32) {
    %c0_i32 = arith.constant 0 : i32
    %c0_i32_0 = arith.constant 0 : i32
    %c0_i32_1 = arith.constant 0 : i32
    return %c0_i32, %c0_i32_0 : i32, i32
  }
  func.func @transform_1(%arg0: i32) -> (i32, i32) {
    %c0_i32 = arith.constant 0 : i32
    %c0_i32_0 = arith.constant 0 : i32
    return %c0_i32, %arg0 : i32, i32
  }
  func.func @transform_2(%arg0: i32) -> (i32, i32) {
    %c0_i32 = arith.constant 0 : i32
    %c0_i32_0 = arith.constant 0 : i32
    return %c0_i32, %arg0 : i32, i32
  }
  func.func @transform_3(%arg0: i32) -> (i32, i32) {
    %c0_i32 = arith.constant 0 : i32
    %c0_i32_0 = arith.constant 0 : i32
    return %c0_i32, %arg0 : i32, i32
  }
  func.func @transform_4(%arg0: i32) -> (i32, i32) {
    %c0_i32 = arith.constant 0 : i32
    %c0_i32_0 = arith.constant 0 : i32
    return %c0_i32, %arg0 : i32, i32
  }
}

</mosaic_0001>

<bundles_post_ra>
// kernel: tpu_custom_call.1
= control target key start
LH: loop header
LB: loop body
LE: loop exit
PB: predicated region body
PF: predicated region fallthrough
CT: control target
= control target key end

     0   :  { %v240_v1 = vmov 0.0   ;;  %vm241_vm0 = vmmov 0   ;;  %s331_s0 = inlined_call_operand.vmem [shape: f32[8,128], index: 0, kind: input, shape index: {}]   ;;  %s332_s1 = inlined_call_operand.vmem [shape: f32[128,32], index: 1, kind: input, shape index: {}]   ;;  %s333_s2 = inlined_call_operand.vmem [shape: f32[1,32], index: 2, kind: input, shape index: {}]   ;;  %s334_s3 = inlined_call_operand.vmem [shape: f32[1,32], index: 3, kind: input, shape index: {}]   ;;  %s335_s4 = inlined_call_operand.hbm [shape: f32[8,32], index: 4, kind: output, shape index: {}]  }
   0x1   :  { %v34_v0 = vld [vmem:[%s332_s1 + $0x78] sm:$0xff]  ;;  %178 = vmatprep.subr.mxu0 %v240_v1  ;;  %v33_v2 = vld [vmem:[%s332_s1 + $0x70] sm:$0xff]  ;;  %210 = vmatprep.mubr.msk.f32.mxu0 %vm241_vm0, %v240_v1  ;;  %v32_v3 = vld [vmem:[%s332_s1 + $0x68] sm:$0xff] }
   0x2   :  { %179 = vmatpush3.msra.mxu0 %v34_v0  ;;  %v31_v4 = vld [vmem:[%s332_s1 + $0x60] sm:$0xff] }
   0x3   :  { %180 = vmatprep.subr.mxu0 %v240_v1 }
   0x4   :  { %181 = vmatpush3.msra.mxu0 %v33_v2 }
   0x5   :  { %182 = vmatprep.subr.mxu0 %v240_v1 }
   0x6   :  { %9 = vsyncpa [#allocation3], 0  ;;  %183 = vmatpush3.msra.mxu0 %v32_v3  ;;  %v30_v5 = vld [vmem:[%s332_s1 + $0x58] sm:$0xff]  ;;  %v29_v6 = vld [vmem:[%s332_s1 + $0x50] sm:$0xff]  ;;  %vm105_vm1 = vcmask 261120   ;;  %v130_v39 = vlaneseq  ;;  %s242_s25 = smov [#allocation2]  }
   0x7   :  { %184 = vmatprep.subr.mxu0 %v240_v1  ;;  %v28_v7 = vld [vmem:[%s332_s1 + $0x48] sm:$0xff]  ;;  %v27_v8 = vld [vmem:[%s332_s1 + $0x40] sm:$0xff]  ;;  %v26_v9 = vld [vmem:[%s332_s1 + $0x38] sm:$0xff]  ;;  %s152_s26 = sshll.u32 %s242_s25, 4  ;;  %s153_s26 = int_to_ptr.vmem [resolvable:$true] %s152_s26 }
   0x8   :  { %185 = vmatpush3.msra.mxu0 %v31_v4  ;;  %v25_v10 = vld [vmem:[%s332_s1 + $0x30] sm:$0xff]  ;;  %v24_v11 = vld [vmem:[%s332_s1 + $0x28] sm:$0xff]  ;;  %v23_v12 = vld [vmem:[%s332_s1 + $0x20] sm:$0xff]  ;;  %v131_v40 = vshrl.u32 %v130_v39, 7  ;;  %s218_s27 = scalar_lea.vmem %s153_s26, 128  ;;  %p223_p1 = scmp.lt.s32.totalorder %s153_s26, %s153_s26 }
   0x9   :  { %186 = vmatprep.subr.mxu0 %v240_v1  ;;  %v22_v13 = vld [vmem:[%s332_s1 + $0x18] sm:$0xff]  ;;  %v21_v14 = vld [vmem:[%s332_s1 + $0x10] sm:$0xff]  ;;  %v20_v15 = vld [vmem:[%s332_s1 + $0x8] sm:$0xff]  ;;  %p219_p0 = scmp.ne.s32.totalorder %s153_s26, %s218_s27  ;;  %p224_p2 = scmp.lt.s32.totalorder %s218_s27, %s218_s27 }
   0xa   :  { %187 = vmatpush3.msra.mxu0 %v30_v5  ;;  %v19_v16 = vld [vmem:[%s332_s1] sm:$0xff]  ;;  %v132_v42 = vsub.s32 0, %v131_v40 }
   0xb   :  { %188 = vmatprep.subr.mxu0 %v240_v1  ;;  %v18_v17 = vld [vmem:[%s331_s0] sm:$0xff]  ;;  %p225_p3 = por %p224_p2, %p223_p1 }
   0xc   :  { %189 = vmatpush3.msra.mxu0 %v29_v6  ;;  %v125_v41 = vld [vmem:[%s333_s2] sm:$0x1] }
   0xd   :  { %190 = vmatprep.subr.mxu0 %v240_v1  ;;  %v160_v46 = vld [vmem:[%s334_s3] ss:$0 sm:$0xff]  ;;  %p226_p4 = pnand %p225_p3, %p219_p0 }
   0xe   :  { %191 = vmatpush3.msra.mxu0 %v28_v7 }
   0xf   :  { %192 = vmatprep.subr.mxu0 %v240_v1 }
  0x10   :  { %193 = vmatpush3.msra.mxu0 %v27_v8 }
  0x11   :  { %194 = vmatprep.subr.mxu0 %v240_v1 }
  0x12   :  { %195 = vmatpush3.msra.mxu0 %v26_v9 }
  0x13   :  { %196 = vmatprep.subr.mxu0 %v240_v1 }
  0x14   :  { %197 = vmatpush3.msra.mxu0 %v25_v10 }
  0x15   :  { %198 = vmatprep.subr.mxu0 %v240_v1 }
  0x16   :  { %199 = vmatpush3.msra.mxu0 %v24_v11 }
  0x17   :  { %200 = vmatprep.subr.mxu0 %v240_v1 }
  0x18   :  { %201 = vmatpush3.msra.mxu0 %v23_v12 }
  0x19   :  { %202 = vmatprep.subr.mxu0 %v240_v1 }
  0x1a   :  { %203 = vmatpush3.msra.mxu0 %v22_v13 }
  0x1b   :  { %204 = vmatprep.subr.mxu0 %v240_v1 }
  0x1c   :  { %205 = vmatpush3.msra.mxu0 %v21_v14 }
  0x1d   :  { %206 = vmatprep.subr.mxu0 %v240_v1 }
  0x1e   :  { %207 = vmatpush3.msra.mxu0 %v20_v15 }
  0x1f   :  { %208 = vmatprep.subr.mxu0 %v240_v1 }
  0x20   :  { %209 = vmatpush3.msra.mxu0 %v19_v16 }
  0x21   :  { %211 = vmatmul.mubr.f32.vlgmr.msra.gmra.mxu0 %v18_v17 }
  0xe1   :  { %v101_v18 = vpop.f32.mrf.mxu0 }
  0xe2   :  { %v106_v19 = vsel %vm105_vm1, %v101_v18, 0.0 }
  0xe3   :  { %v107_v20 = vrot.slane %v106_v19, 4  ;;  %v212_v21 = vpop.f32.mrf.mxu0 }
  0xe5   :  { %v108_v22 = vadd.f32 %v107_v20, %v106_v19 }
  0xe7   :  { %v109_v23 = vrot.slane %v108_v22, 2 }
  0xe9   :  { %v110_v24 = vadd.f32 %v109_v23, %v108_v22 }
  0xeb   :  { %v111_v25 = vrot.slane %v110_v24, 1 }
  0xed   :  { %v112_v26 = vadd.f32 %v111_v25, %v110_v24 }
  0xef   :  { %v114_v27 = vmul.f32 0.125, %v112_v26 }
  0xf1   :  { %v115_v28 = vsub.f32 %v101_v18, %v114_v27 }
  0xf3   :  { %v116_v29 = vmul.f32 %v115_v28, %v115_v28 }
  0xf5   :  { %v117_v30 = vsel %vm105_vm1, %v116_v29, 0.0 }
  0xf6   :  { %v118_v31 = vrot.slane %v117_v30, 4 }
  0xf8   :  { %v119_v32 = vadd.f32 %v118_v31, %v117_v30 }
  0xfa   :  { %v120_v33 = vrot.slane %v119_v32, 2 }
  0xfc   :  { %v121_v34 = vadd.f32 %v120_v33, %v119_v32 }
  0xfe   :  { %v122_v35 = vrot.slane %v121_v34, 1 }
 0x100   :  { %v123_v36 = vadd.f32 %v122_v35, %v121_v34 }
 0x102   :  { %v124_v37 = vmul.f32 0.125, %v123_v36 }
 0x104   :  { %v126_v38 = vadd.f32 1e-05, %v124_v37 }
 0x106   :  { %216 = vrsqrt.f32 %v126_v38 }
 0x113   :  { %v217_v43 = vpop.eup %216 }
 0x114   :  { %v128_v44 = vmul.f32 %v217_v43, %v125_v41 }
 0x116   :  { %v133_v45 = vrot.slane %v128_v44, %v132_v42 }
 0x118   :  { %v135_v47 = vmul.f32 %v133_v45, %v115_v28 }
 0x11a   :  { %v143_v48 = vadd.f32 %v160_v46, %v135_v47 }
 0x11c   :  { %v144_v49 = vmax.f32 %v143_v48, 0.0 }
 0x11e   :  { %145 = vst.msk [vmem:[#allocation2] sm:$0xff] %vm105_vm1, %v144_v49 }
 0x11f   :  { %229 = shalt.err (!%p226_p4)
}
 0x120   :  { %155 = dma.vmem_to_hbm [thread:$0]  %s153_s26, 128, %s335_s4, [#allocation3]  }
 0x121   :  { %238 = dma.done.wait [#allocation3], 128  }
 0x122   :  { %239 = vsyncadd [#allocation3], 4294967168 }
 0x123   :  { %159 = vsyncpa [#allocation3], 1 }

// kernel: tpu_custom_call.1
= control target key start
LH: loop header
LB: loop body
LE: loop exit
PB: predicated region body
PF: predicated region fallthrough
CT: control target
= control target key end

     0   :  { %v240_v1 = vmov 0.0   ;;  %vm241_vm0 = vmmov 0   ;;  %s331_s0 = inlined_call_operand.vmem [shape: f32[8,128], index: 0, kind: input, shape index: {}]   ;;  %s332_s1 = inlined_call_operand.vmem [shape: f32[128,32], index: 1, kind: input, shape index: {}]   ;;  %s333_s2 = inlined_call_operand.vmem [shape: f32[1,32], index: 2, kind: input, shape index: {}]   ;;  %s334_s3 = inlined_call_operand.vmem [shape: f32[1,32], index: 3, kind: input, shape index: {}]   ;;  %s335_s4 = inlined_call_operand.hbm [shape: f32[8,32], index: 4, kind: output, shape index: {}]  }
   0x1   :  { %v34_v0 = vld [vmem:[%s332_s1 + $0x78] sm:$0xff]  ;;  %178 = vmatprep.subr.mxu0 %v240_v1  ;;  %v33_v2 = vld [vmem:[%s332_s1 + $0x70] sm:$0xff]  ;;  %210 = vmatprep.mubr.msk.f32.mxu0 %vm241_vm0, %v240_v1  ;;  %v32_v3 = vld [vmem:[%s332_s1 + $0x68] sm:$0xff] }
   0x2   :  { %179 = vmatpush3.msra.mxu0 %v34_v0  ;;  %v31_v4 = vld [vmem:[%s332_s1 + $0x60] sm:$0xff] }
   0x3   :  { %180 = vmatprep.subr.mxu0 %v240_v1 }
   0x4   :  { %181 = vmatpush3.msra.mxu0 %v33_v2 }
   0x5   :  { %182 = vmatprep.subr.mxu0 %v240_v1 }
   0x6   :  { %9 = vsyncpa [#allocation3], 0  ;;  %183 = vmatpush3.msra.mxu0 %v32_v3  ;;  %v30_v5 = vld [vmem:[%s332_s1 + $0x58] sm:$0xff]  ;;  %v29_v6 = vld [vmem:[%s332_s1 + $0x50] sm:$0xff]  ;;  %vm105_vm1 = vcmask 261120   ;;  %v130_v39 = vlaneseq  ;;  %s242_s25 = smov [#allocation2]  }
   0x7   :  { %184 = vmatprep.subr.mxu0 %v240_v1  ;;  %v28_v7 = vld [vmem:[%s332_s1 + $0x48] sm:$0xff]  ;;  %v27_v8 = vld [vmem:[%s332_s1 + $0x40] sm:$0xff]  ;;  %v26_v9 = vld [vmem:[%s332_s1 + $0x38] sm:$0xff]  ;;  %s152_s26 = sshll.u32 %s242_s25, 4  ;;  %s153_s26 = int_to_ptr.vmem [resolvable:$true] %s152_s26 }
   0x8   :  { %185 = vmatpush3.msra.mxu0 %v31_v4  ;;  %v25_v10 = vld [vmem:[%s332_s1 + $0x30] sm:$0xff]  ;;  %v24_v11 = vld [vmem:[%s332_s1 + $0x28] sm:$0xff]  ;;  %v23_v12 = vld [vmem:[%s332_s1 + $0x20] sm:$0xff]  ;;  %v131_v40 = vshrl.u32 %v130_v39, 7  ;;  %s218_s27 = scalar_lea.vmem %s153_s26, 128  ;;  %p223_p1 = scmp.lt.s32.totalorder %s153_s26, %s153_s26 }
   0x9   :  { %186 = vmatprep.subr.mxu0 %v240_v1  ;;  %v22_v13 = vld [vmem:[%s332_s1 + $0x18] sm:$0xff]  ;;  %v21_v14 = vld [vmem:[%s332_s1 + $0x10] sm:$0xff]  ;;  %v20_v15 = vld [vmem:[%s332_s1 + $0x8] sm:$0xff]  ;;  %p219_p0 = scmp.ne.s32.totalorder %s153_s26, %s218_s27  ;;  %p224_p2 = scmp.lt.s32.totalorder %s218_s27, %s218_s27 }
   0xa   :  { %187 = vmatpush3.msra.mxu0 %v30_v5  ;;  %v19_v16 = vld [vmem:[%s332_s1] sm:$0xff]  ;;  %v132_v42 = vsub.s32 0, %v131_v40 }
   0xb   :  { %188 = vmatprep.subr.mxu0 %v240_v1  ;;  %v18_v17 = vld [vmem:[%s331_s0] sm:$0xff]  ;;  %p225_p3 = por %p224_p2, %p223_p1 }
   0xc   :  { %189 = vmatpush3.msra.mxu0 %v29_v6  ;;  %v125_v41 = vld [vmem:[%s333_s2] sm:$0x1] }
   0xd   :  { %190 = vmatprep.subr.mxu0 %v240_v1  ;;  %v160_v46 = vld [vmem:[%s334_s3] ss:$0 sm:$0xff]  ;;  %p226_p4 = pnand %p225_p3, %p219_p0 }
   0xe   :  { %191 = vmatpush3.msra.mxu0 %v28_v7 }
   0xf   :  { %192 = vmatprep.subr.mxu0 %v240_v1 }
  0x10   :  { %193 = vmatpush3.msra.mxu0 %v27_v8 }
  0x11   :  { %194 = vmatprep.subr.mxu0 %v240_v1 }
  0x12   :  { %195 = vmatpush3.msra.mxu0 %v26_v9 }
  0x13   :  { %196 = vmatprep.subr.mxu0 %v240_v1 }
  0x14   :  { %197 = vmatpush3.msra.mxu0 %v25_v10 }
  0x15   :  { %198 = vmatprep.subr.mxu0 %v240_v1 }
  0x16   :  { %199 = vmatpush3.msra.mxu0 %v24_v11 }
  0x17   :  { %200 = vmatprep.subr.mxu0 %v240_v1 }
  0x18   :  { %201 = vmatpush3.msra.mxu0 %v23_v12 }
  0x19   :  { %202 = vmatprep.subr.mxu0 %v240_v1 }
  0x1a   :  { %203 = vmatpush3.msra.mxu0 %v22_v13 }
  0x1b   :  { %204 = vmatprep.subr.mxu0 %v240_v1 }
  0x1c   :  { %205 = vmatpush3.msra.mxu0 %v21_v14 }
  0x1d   :  { %206 = vmatprep.subr.mxu0 %v240_v1 }
  0x1e   :  { %207 = vmatpush3.msra.mxu0 %v20_v15 }
  0x1f   :  { %208 = vmatprep.subr.mxu0 %v240_v1 }
  0x20   :  { %209 = vmatpush3.msra.mxu0 %v19_v16 }
  0x21   :  { %211 = vmatmul.mubr.f32.vlgmr.msra.gmra.mxu0 %v18_v17 }
  0xe1   :  { %v101_v18 = vpop.f32.mrf.mxu0 }
  0xe2   :  { %v106_v19 = vsel %vm105_vm1, %v101_v18, 0.0 }
  0xe3   :  { %v107_v20 = vrot.slane %v106_v19, 4  ;;  %v212_v21 = vpop.f32.mrf.mxu0 }
  0xe5   :  { %v108_v22 = vadd.f32 %v107_v20, %v106_v19 }
  0xe7   :  { %v109_v23 = vrot.slane %v108_v22, 2 }
  0xe9   :  { %v110_v24 = vadd.f32 %v109_v23, %v108_v22 }
  0xeb   :  { %v111_v25 = vrot.slane %v110_v24, 1 }
  0xed   :  { %v112_v26 = vadd.f32 %v111_v25, %v110_v24 }
  0xef   :  { %v114_v27 = vmul.f32 0.125, %v112_v26 }
  0xf1   :  { %v115_v28 = vsub.f32 %v101_v18, %v114_v27 }
  0xf3   :  { %v116_v29 = vmul.f32 %v115_v28, %v115_v28 }
  0xf5   :  { %v117_v30 = vsel %vm105_vm1, %v116_v29, 0.0 }
  0xf6   :  { %v118_v31 = vrot.slane %v117_v30, 4 }
  0xf8   :  { %v119_v32 = vadd.f32 %v118_v31, %v117_v30 }
  0xfa   :  { %v120_v33 = vrot.slane %v119_v32, 2 }
  0xfc   :  { %v121_v34 = vadd.f32 %v120_v33, %v119_v32 }
  0xfe   :  { %v122_v35 = vrot.slane %v121_v34, 1 }
 0x100   :  { %v123_v36 = vadd.f32 %v122_v35, %v121_v34 }
 0x102   :  { %v124_v37 = vmul.f32 0.125, %v123_v36 }
 0x104   :  { %v126_v38 = vadd.f32 1e-05, %v124_v37 }
 0x106   :  { %216 = vrsqrt.f32 %v126_v38 }
 0x113   :  { %v217_v43 = vpop.eup %216 }
 0x114   :  { %v128_v44 = vmul.f32 %v217_v43, %v125_v41 }
 0x116   :  { %v133_v45 = vrot.slane %v128_v44, %v132_v42 }
 0x118   :  { %v135_v47 = vmul.f32 %v133_v45, %v115_v28 }
 0x11a   :  { %v143_v48 = vadd.f32 %v160_v46, %v135_v47 }
 0x11c   :  { %v144_v49 = vmax.f32 %v143_v48, 0.0 }
 0x11e   :  { %145 = vst.msk [vmem:[#allocation2] sm:$0xff] %vm105_vm1, %v144_v49 }
 0x11f   :  { %229 = shalt.err (!%p226_p4)
}
 0x120   :  { %155 = dma.vmem_to_hbm [thread:$0]  %s153_s26, 128, %s335_s4, [#allocation3]  }
 0x121   :  { %238 = dma.done.wait [#allocation3], 128  }
 0x122   :  { %239 = vsyncadd [#allocation3], 4294967168 }
 0x123   :  { %159 = vsyncpa [#allocation3], 1 }

</bundles_post_ra>
